<compile_context>
chip_gen: v6e
topology: v6e:2x2x1
jax: 0.10.0
libtpu: 0.0.40
codegen_flags: <defaults>
</compile_context>

<pallas_src>
import functools

import jax
import jax.numpy as jnp
from jax import lax
from jax.experimental import pallas as pl
from jax.experimental.pallas import tpu as pltpu


# ----------------------------------------------------------------------------
# Pallas kernel: fused  patches @ weight -> *scale + shift -> (+res) -> act
# ----------------------------------------------------------------------------
def _fused_kernel(act, has_res, p_ref, w_ref, s_ref, t_ref, *rest):
    if has_res:
        res_ref, o_ref = rest
    else:
        (o_ref,) = rest
    y = jnp.dot(p_ref[...], w_ref[...], preferred_element_type=jnp.float32)
    y = y * s_ref[...] + t_ref[...]
    if has_res:
        y = y + res_ref[...]          # ResNet adds residual BEFORE the ReLU
    if act == "relu":
        y = jnp.maximum(y, 0.0)
    o_ref[...] = y


_TILE_CANDIDATES = (512, 256, 128, 64, 32, 16, 8)


def _pick_tile(m):
    for t in _TILE_CANDIDATES:
        if m % t == 0:
            return t
    return m  # single full-extent block (always a legal block shape)


def fused_matmul(patches, weight, scale, shift, residual, act):
    """(M,K) @ (K,N) -> per-column affine -> optional residual -> activation.

    Operands are passed UNPADDED; only M is tiled (grid axis marked parallel).
    """
    M, K = patches.shape
    K2, N = weight.shape
    assert K == K2
    tm = _pick_tile(M)
    grid = (M // tm,)

    s2 = scale.reshape(1, N).astype(jnp.float32)
    t2 = shift.reshape(1, N).astype(jnp.float32)

    in_specs = [
        pl.BlockSpec((tm, K), lambda i: (i, 0)),   # patches tile
        pl.BlockSpec((K, N), lambda i: (0, 0)),    # weight (resident)
        pl.BlockSpec((1, N), lambda i: (0, 0)),    # scale
        pl.BlockSpec((1, N), lambda i: (0, 0)),    # shift
    ]
    args = [patches.astype(jnp.float32), weight.astype(jnp.float32), s2, t2]
    if residual is not None:
        in_specs.append(pl.BlockSpec((tm, N), lambda i: (i, 0)))
        args.append(residual.astype(jnp.float32))

    return pl.pallas_call(
        functools.partial(_fused_kernel, act, residual is not None),
        out_shape=jax.ShapeDtypeStruct((M, N), jnp.float32),
        grid=grid,
        in_specs=in_specs,
        out_specs=pl.BlockSpec((tm, N), lambda i: (i, 0)),
        compiler_params=pltpu.CompilerParams(
            dimension_semantics=("parallel",),
            vmem_limit_bytes=48 * 1024 * 1024,
        ),
    )(*args)


# ----------------------------------------------------------------------------
# Fused Conv2d (+bias/BN folded) (+residual) (+ReLU), NHWC in / NHWC out
# ----------------------------------------------------------------------------
def conv_bn_act(x_nhwc, layer, act, residual_nhwc=None):
    w = layer["w"]                         # (Cout, Cin, kh, kw)  (PyTorch layout)
    cout, cin, kh, kw = w.shape
    sh, sw = layer["stride"]
    ph, pw = layer["pad"]

    # im2col patches (NHWC): feature dim ordered (c_in, kh, kw) -> matches the
    # PyTorch OIHW weight flattening below.
    patches = lax.conv_general_dilated_patches(
        x_nhwc, (kh, kw), (sh, sw), [(ph, ph), (pw, pw)],
        dimension_numbers=("NHWC", "HWIO", "NHWC"))
    nb, ho, wo, K = patches.shape
    M = nb * ho * wo
    p = patches.reshape(M, K)
    w2 = w.reshape(cout, cin * kh * kw).T  # (K, Cout)

    bn = layer.get("bn")
    bias = layer.get("b")
    if bn is not None:
        s = bn["gamma"] * lax.rsqrt(bn["var"] + bn["eps"])
        shift = bn["beta"] - bn["mean"] * s
        if bias is not None:
            shift = shift + bias * s
        scale = s
    else:
        scale = jnp.ones((cout,), jnp.float32)
        shift = bias if bias is not None else jnp.zeros((cout,), jnp.float32)

    res = None
    if residual_nhwc is not None:
        res = residual_nhwc.reshape(M, cout)

    y = fused_matmul(p, w2, scale, shift, res, act)
    return y.reshape(nb, ho, wo, cout)


# ----------------------------------------------------------------------------
# ResNet-45 (DAN resnet.py) structure
# ----------------------------------------------------------------------------
def basic_block(x, blk):
    out = conv_bn_act(x, blk["conv1"], "relu")
    if blk["downsample"] is not None:
        residual = conv_bn_act(x, blk["downsample"], None)
    else:
        residual = x
    # conv2 + BN, add residual, then ReLU -- all inside one kernel
    out = conv_bn_act(out, blk["conv2"], "relu", residual_nhwc=residual)
    return out


def feature_extractor_forward(params, x_nchw):
    """Feature_Extractor.forward: returns the list of multi-scale features (NCHW)."""
    x = jnp.transpose(x_nchw, (0, 2, 3, 1)).astype(jnp.float32)   # -> NHWC
    out_features = []

    x = conv_bn_act(x, params["conv1"], "relu")
    tmp_shape = x.shape[1:3]

    layers = params["layers"]
    for layer in layers[:-1]:                 # layer1 .. layer4
        for blk in layer:
            x = basic_block(x, blk)
        if x.shape[1:3] != tmp_shape:
            tmp_shape = x.shape[1:3]
            out_features.append(x)
    for blk in layers[-1]:                    # layer5
        x = basic_block(x, blk)

    if not params["compress_layer"]:
        out_features.append(x)
    else:
        if x.shape[1:3] != tmp_shape:
            tmp_shape = x.shape[1:3]
            out_features.append(x)
        x = conv_bn_act(x, params["layer6"], "relu")
        out_features.append(x)

    # back to NCHW only at the module boundary (PyTorch layout)
    return [jnp.transpose(f, (0, 3, 1, 2)) for f in out_features]


# ----------------------------------------------------------------------------
# Deterministic parameter construction mirroring resnet45(strides, compress)
# ----------------------------------------------------------------------------
def _pair(v):
    return tuple(v) if isinstance(v, (tuple, list)) else (v, v)


def build_feature_extractor(key, strides, compress_layer, input_shape):
    keys = iter(jax.random.split(key, 512))

    def nk():
        return next(keys)

    def make_bn(c):
        return dict(
            gamma=1.0 + 0.1 * jax.random.normal(nk(), (c,), jnp.float32),
            beta=0.05 * jax.random.normal(nk(), (c,), jnp.float32),
            mean=0.05 * jax.random.normal(nk(), (c,), jnp.float32),
            var=0.9 + 0.1 * jnp.abs(jax.random.normal(nk(), (c,), jnp.float32)),
            eps=1e-5,
        )

    def conv_p(cin, cout, kh, kw, stride, pad, bias, bn):
        p = dict(
            w=0.1 * jax.random.normal(nk(), (cout, cin, kh, kw), jnp.float32),
            stride=_pair(stride),
            pad=_pair(pad),
        )
        p["b"] = (0.05 * jax.random.normal(nk(), (cout,), jnp.float32)) if bias else None
        p["bn"] = make_bn(cout) if bn else None
        return p

    in_ch = input_shape[0]
    params = {}
    # conv1 + bn1 + relu
    params["conv1"] = conv_p(in_ch, 32, 3, 3, strides[0], (1, 1), bias=False, bn=True)

    layers_cfg = [3, 4, 6, 6, 3]          # resnet45
    planes_cfg = [32, 64, 128, 256, 512]
    inplanes = 32
    layers = []
    for li, (planes, nblocks) in enumerate(zip(planes_cfg, layers_cfg)):
        stride = _pair(strides[li + 1])
        blocks = []
        for bi in range(nblocks):
            s = stride if bi == 0 else (1, 1)
            blk = dict(
                conv1=conv_p(inplanes, planes, 3, 3, s, (1, 1), bias=False, bn=True),
                conv2=conv_p(planes, planes, 3, 3, (1, 1), (1, 1), bias=False, bn=True),
                downsample=None,
            )
            if bi == 0 and (s != (1, 1) or inplanes != planes):
                blk["downsample"] = conv_p(inplanes, planes, 1, 1, s, (0, 0),
                                           bias=False, bn=True)
            blocks.append(blk)
            inplanes = planes
        layers.append(blocks)
    params["layers"] = layers
    params["compress_layer"] = bool(compress_layer)
    if compress_layer:
        # Conv2d(512, 256, kernel_size=(3,1), padding=(0,0)) + BN + ReLU
        params["layer6"] = conv_p(512, 256, 3, 1, (1, 1), (0, 0), bias=True, bn=True)
    return params


if __name__ == "__main__":
    # small, self-consistent configuration (DAN-style strides; compress head on)
    strides = [(1, 1), (2, 2), (1, 1), (2, 2), (1, 1), (1, 1)]
    compress_layer = True
    input_shape = (3, 16, 32)                   # (C, H, W)

    key = jax.random.PRNGKey(0)
    kp, kx = jax.random.split(key)
    params = build_feature_extractor(kp, strides, compress_layer, input_shape)

    x = jax.random.normal(kx, (2,) + input_shape, jnp.float32)   # NCHW input
    feats = feature_extractor_forward(params, x)
    feats = jax.block_until_ready(feats)

    expected = [(2, 32, 8, 16), (2, 128, 4, 8), (2, 256, 2, 8)]
    got = [tuple(f.shape) for f in feats]
    assert got == expected, got
    assert all(bool(jnp.all(jnp.isfinite(f))) for f in feats)
    print("KERNEL_OK")
</pallas_src>

<mosaic_0001>
module attributes {stable_mosaic.version = 11 : i64} {
  func.func @_fused_kernel(%arg0: i32, %arg1: memref<512x27xf32, #tpu.memory_space<vmem>>, %arg2: memref<27x32xf32, #tpu.memory_space<vmem>>, %arg3: memref<1x32xf32, #tpu.memory_space<vmem>>, %arg4: memref<1x32xf32, #tpu.memory_space<vmem>>, %arg5: memref<512x32xf32, #tpu.memory_space<vmem>>) attributes {dimension_semantics = [#tpu.dimension_semantics<parallel>], iteration_bounds = array<i64: 2>, scalar_prefetch = 0 : i64, scratch_operands = 0 : i64, tpu.core_type = #tpu.core_type<tc>, window_params = [{transform_indices = @transform_0, window_bounds = array<i64: 512, 27>}, {pipeline_mode = #tpu.pipeline_mode<synchronous>, transform_indices = @transform_1, window_bounds = array<i64: 27, 32>}, {pipeline_mode = #tpu.pipeline_mode<synchronous>, transform_indices = @transform_2, window_bounds = array<i64: 1, 32>}, {pipeline_mode = #tpu.pipeline_mode<synchronous>, transform_indices = @transform_3, window_bounds = array<i64: 1, 32>}, {transform_indices = @transform_4, window_bounds = array<i64: 512, 32>}]} {
    %c0 = arith.constant 0 : index
    %c0_0 = arith.constant 0 : index
    %0 = vector.load %arg1[%c0, %c0_0] : memref<512x27xf32, #tpu.memory_space<vmem>>, vector<512x27xf32>
    %c0_1 = arith.constant 0 : index
    %c0_2 = arith.constant 0 : index
    %1 = vector.load %arg2[%c0_1, %c0_2] : memref<27x32xf32, #tpu.memory_space<vmem>>, vector<27x32xf32>
    %cst = arith.constant dense<0.000000e+00> : vector<512x32xf32>
    %2 = tpu.matmul %0, %1, %cst {dimension_numbers = #tpu.dot_dimension_numbers<[1], [0], [0], [1], [0, 0, 1, 1], [], []>} : vector<512x27xf32>, vector<27x32xf32>, vector<512x32xf32> -> vector<512x32xf32>
    %c0_3 = arith.constant 0 : index
    %c0_4 = arith.constant 0 : index
    %3 = vector.load %arg3[%c0_3, %c0_4] : memref<1x32xf32, #tpu.memory_space<vmem>>, vector<1x32xf32>
    %4 = vector.broadcast %3 : vector<1x32xf32> to vector<512x32xf32>
    %5 = arith.mulf %2, %4 : vector<512x32xf32>
    %c0_5 = arith.constant 0 : index
    %c0_6 = arith.constant 0 : index
    %6 = vector.load %arg4[%c0_5, %c0_6] : memref<1x32xf32, #tpu.memory_space<vmem>>, vector<1x32xf32>
    %7 = vector.broadcast %6 : vector<1x32xf32> to vector<512x32xf32>
    %8 = arith.addf %5, %7 : vector<512x32xf32>
    %cst_7 = arith.constant 0.000000e+00 : f32
    %9 = vector.broadcast %cst_7 : f32 to vector<512x32xf32>
    %10 = arith.maximumf %8, %9 : vector<512x32xf32>
    %c0_8 = arith.constant 0 : index
    %c0_9 = arith.constant 0 : index
    %11 = vector.load %arg5[%c0_8, %c0_9] : memref<512x32xf32, #tpu.memory_space<vmem>>, vector<512x32xf32>
    tpu.vector_store %arg5[%c0_8, %c0_9], %10 {strides = array<i32>} : memref<512x32xf32, #tpu.memory_space<vmem>>, vector<512x32xf32>,
    return
  }
  func.func @transform_0(%arg0: i32) -> (i32, i32) {
    %c0_i32 = arith.constant 0 : i32
    %c0_i32_0 = arith.constant 0 : i32
    return %arg0, %c0_i32 : i32, i32
  }
  func.func @transform_1(%arg0: i32) -> (i32, i32) {
    %c0_i32 = arith.constant 0 : i32
    %c0_i32_0 = arith.constant 0 : i32
    %c0_i32_1 = arith.constant 0 : i32
    return %c0_i32, %c0_i32_0 : i32, i32
  }
  func.func @transform_2(%arg0: i32) -> (i32, i32) {
    %c0_i32 = arith.constant 0 : i32
    %c0_i32_0 = arith.constant 0 : i32
    %c0_i32_1 = arith.constant 0 : i32
    return %c0_i32, %c0_i32_0 : i32, i32
  }
  func.func @transform_3(%arg0: i32) -> (i32, i32) {
    %c0_i32 = arith.constant 0 : i32
    %c0_i32_0 = arith.constant 0 : i32
    %c0_i32_1 = arith.constant 0 : i32
    return %c0_i32, %c0_i32_0 : i32, i32
  }
  func.func @transform_4(%arg0: i32) -> (i32, i32) {
    %c0_i32 = arith.constant 0 : i32
    %c0_i32_0 = arith.constant 0 : i32
    return %arg0, %c0_i32 : i32, i32
  }
}

</mosaic_0001>

<bundles_post_ra>
// kernel: tpu_custom_call.1
= control target key start
LH: loop header
LB: loop body
LE: loop exit
PB: predicated region body
PF: predicated region fallthrough
CT: control target
= control target key end

     0   :  { %s1477_s15 = smov 0   ;;  %s1911_s0 = inlined_call_operand.vmem [shape: f32[1024,27], index: 0, kind: input, shape index: {}]   ;;  %s1912_s1 = inlined_call_operand.vmem [shape: f32[27,32], index: 1, kind: input, shape index: {}]   ;;  %s1913_s2 = inlined_call_operand.vmem [shape: f32[1,32], index: 2, kind: input, shape index: {}]   ;;  %s1914_s3 = inlined_call_operand.vmem [shape: f32[1,32], index: 3, kind: input, shape index: {}]   ;;  %s1915_s4 = inlined_call_operand.vmem [shape: f32[1024,32], index: 4, kind: output, shape index: {}]  }
   0x1 LB: > { %s1178_s16 = sadd.s32 4294967295, %s1450_s15   ;;  %p1182_p0 = scmp.ge.s32.totalorder %s1450_s15, 1  ;;  %s1450_s15 = sphi %s1477_s15, %s14_s15  }
   0x2   : > { %p163_p1 = scmp.lt.s32.totalorder %s1450_s15, 3 }
   0x4   : > { %p164_p2 = pnand %p1182_p0, %p163_p1 }
   0x5   : > { %s1183_s21 = sshll.u32 (!%p164_p2), %s1178_s16, 6 }
   0x6   : > { %167 = sbr.rel (%p164_p2) target bundleno = 283 (0x11b), region = 36  ;;  %p190_p3 = scmp.lt.s32.totalorder (!%p164_p2), %s1183_s21, 127 }
   0xb   : > { %v268_v0 = vld [vmem:[%s1912_s1 + $0x18] sm:$0x7]  ;;  %vm462_vm0 = vcmask 1042432   ;;  %v267_v1 = vld [vmem:[%s1912_s1 + $0x10] sm:$0xff]  ;;  %v266_v2 = vld [vmem:[%s1912_s1 + $0x8] sm:$0xff]  ;;  %s1917_s21 = smov (!%p190_p3, %s1183_s21), 127 }
   0xc   : > { %1324 = vmatprep.subr.msk.mxu0 %vm462_vm0, %v268_v0  ;;  %1428 = vmatprep.subr.msk.mxu1 %vm462_vm0, %v268_v0  ;;  %v265_v3 = vld [vmem:[%s1912_s1] sm:$0xff]  ;;  %s1184_s26 = sshll.u32 %s1917_s21, 3  ;;  %vm269_vm1 = vcmask 220160   ;;  %vm1057_vm2 = vcmask 261120  }
   0xd   : > { %1325 = vmatpush3.msk.msra.mxu0 %vm462_vm0, %v268_v0  ;;  %1432 = vmatpush3.msk.msra.mxu1 %vm462_vm0, %v268_v0  ;;  %s1505_s29 = scalar_lea.vmem %s1911_s0, %s1184_s26  ;;  %s1656_s10 = scalar_lea.vmem %s1915_s4, %s1184_s26 }
   0xe   : > { %1326 = vmatprep.subr.mxu0 %v267_v1  ;;  %1429 = vmatprep.subr.mxu1 %v267_v1  ;;  %v201_v4 = vld [vmem:[%s1505_s29] sm:$0xff]  ;;  %v202_v6 = vld [vmem:[%s1505_s29 + $0x8] sm:$0xff]  ;;  %v203_v8 = vld [vmem:[%s1505_s29 + $0x10] sm:$0xff] }
   0xf   : > { %1327 = vmatpush3.msra.mxu0 %v267_v1  ;;  %1433 = vmatpush3.msra.mxu1 %v267_v1  ;;  %v233_v5 = vld [vmem:[%s1505_s29 + $0x100] sm:$0xff]  ;;  %v234_v7 = vld [vmem:[%s1505_s29 + $0x108] sm:$0xff]  ;;  %v235_v9 = vld [vmem:[%s1505_s29 + $0x110] sm:$0xff] }
  0x10   : > { %1328 = vmatprep.subr.mxu0 %v266_v2  ;;  %1430 = vmatprep.subr.mxu1 %v266_v2  ;;  %v204_v10 = vld [vmem:[%s1505_s29 + $0x18] sm:$0xff]  ;;  %v205_v12 = vld [vmem:[%s1505_s29 + $0x20] sm:$0xff]  ;;  %v206_v14 = vld [vmem:[%s1505_s29 + $0x28] sm:$0xff] }
  0x11   : > { %1329 = vmatpush3.msra.mxu0 %v266_v2  ;;  %1434 = vmatpush3.msra.mxu1 %v266_v2  ;;  %v236_v11 = vld [vmem:[%s1505_s29 + $0x118] sm:$0xff]  ;;  %v237_v13 = vld [vmem:[%s1505_s29 + $0x120] sm:$0xff]  ;;  %v238_v15 = vld [vmem:[%s1505_s29 + $0x128] sm:$0xff] }
  0x12   : > { %1330 = vmatprep.subr.mxu0 %v265_v3  ;;  %1431 = vmatprep.subr.mxu1 %v265_v3  ;;  %v207_v16 = vld [vmem:[%s1505_s29 + $0x30] sm:$0xff]  ;;  %v208_v18 = vld [vmem:[%s1505_s29 + $0x38] sm:$0xff]  ;;  %v209_v20 = vld [vmem:[%s1505_s29 + $0x40] sm:$0xff] }
  0x13   : > { %1331 = vmatpush3.msra.mxu0 %v265_v3  ;;  %1435 = vmatpush3.msra.mxu1 %v265_v3  ;;  %v239_v17 = vld [vmem:[%s1505_s29 + $0x130] sm:$0xff]  ;;  %v240_v19 = vld [vmem:[%s1505_s29 + $0x138] sm:$0xff]  ;;  %v241_v21 = vld [vmem:[%s1505_s29 + $0x140] sm:$0xff] }
  0x14   : > { %1332 = vmatprep.mubr.msk.f32.mxu0 %vm269_vm1, %v201_v4  ;;  %1380 = vmatprep.mubr.msk.f32.mxu1 %vm269_vm1, %v233_v5  ;;  %v210_v22 = vld [vmem:[%s1505_s29 + $0x48] sm:$0xff]  ;;  %v211_v24 = vld [vmem:[%s1505_s29 + $0x50] sm:$0xff]  ;;  %v212_v26 = vld [vmem:[%s1505_s29 + $0x58] sm:$0xff] }
  0x15   : > { %1333 = vmatmul.mubr.msk.f32.vlgmr.msra.gmra.mxu0 %vm269_vm1, %v202_v6  ;;  %1381 = vmatmul.mubr.msk.f32.vlgmr.msra.gmra.mxu1 %vm269_vm1, %v234_v7  ;;  %v242_v23 = vld [vmem:[%s1505_s29 + $0x148] sm:$0xff]  ;;  %v243_v25 = vld [vmem:[%s1505_s29 + $0x150] sm:$0xff]  ;;  %v244_v27 = vld [vmem:[%s1505_s29 + $0x158] sm:$0xff] }
  0x16   : > { %1335 = vmatprep.mubr.msk.f32.mxu0 %vm269_vm1, %v203_v8  ;;  %1383 = vmatprep.mubr.msk.f32.mxu1 %vm269_vm1, %v235_v9  ;;  %v213_v28 = vld [vmem:[%s1505_s29 + $0x60] sm:$0xff]  ;;  %v214_v30 = vld [vmem:[%s1505_s29 + $0x68] sm:$0xff]  ;;  %v215_v32 = vld [vmem:[%s1505_s29 + $0x70] sm:$0xff] }
  0x17   : > { %v245_v29 = vld [vmem:[%s1505_s29 + $0x160] sm:$0xff]  ;;  %v246_v31 = vld [vmem:[%s1505_s29 + $0x168] sm:$0xff]  ;;  %v247_v33 = vld [vmem:[%s1505_s29 + $0x170] sm:$0xff] }
  0x18   : > { %v216_v34 = vld [vmem:[%s1505_s29 + $0x78] sm:$0xff]  ;;  %v217_v36 = vld [vmem:[%s1505_s29 + $0x80] sm:$0xff]  ;;  %v218_v38 = vld [vmem:[%s1505_s29 + $0x88] sm:$0xff] }
  0x19   : > { %1336 = vmatmul.mubr.msk.f32.gmra.mxu0 %vm269_vm1, %v204_v10  ;;  %1384 = vmatmul.mubr.msk.f32.gmra.mxu1 %vm269_vm1, %v236_v11  ;;  %v248_v35 = vld [vmem:[%s1505_s29 + $0x178] sm:$0xff]  ;;  %v249_v37 = vld [vmem:[%s1505_s29 + $0x180] sm:$0xff]  ;;  %v250_v39 = vld [vmem:[%s1505_s29 + $0x188] sm:$0xff] }
  0x1a   : > { %1338 = vmatprep.mubr.msk.f32.mxu0 %vm269_vm1, %v205_v12  ;;  %1386 = vmatprep.mubr.msk.f32.mxu1 %vm269_vm1, %v237_v13  ;;  %v219_v40 = vld [vmem:[%s1505_s29 + $0x90] sm:$0xff]  ;;  %v220_v42 = vld [vmem:[%s1505_s29 + $0x98] sm:$0xff]  ;;  %v221_v44 = vld [vmem:[%s1505_s29 + $0xa0] sm:$0xff] }
  0x1b   : > { %v251_v41 = vld [vmem:[%s1505_s29 + $0x190] sm:$0xff]  ;;  %v252_v43 = vld [vmem:[%s1505_s29 + $0x198] sm:$0xff]  ;;  %v253_v45 = vld [vmem:[%s1505_s29 + $0x1a0] sm:$0xff] }
  0x1c   : > { %v222_v46 = vld [vmem:[%s1505_s29 + $0xa8] sm:$0xff]  ;;  %v223_v48 = vld [vmem:[%s1505_s29 + $0xb0] sm:$0xff]  ;;  %v224_v50 = vld [vmem:[%s1505_s29 + $0xb8] sm:$0xff] }
  0x1d   : > { %1339 = vmatmul.mubr.msk.f32.gmra.mxu0 %vm269_vm1, %v206_v14  ;;  %1387 = vmatmul.mubr.msk.f32.gmra.mxu1 %vm269_vm1, %v238_v15  ;;  %v254_v47 = vld [vmem:[%s1505_s29 + $0x1a8] sm:$0xff]  ;;  %v255_v49 = vld [vmem:[%s1505_s29 + $0x1b0] sm:$0xff]  ;;  %v256_v51 = vld [vmem:[%s1505_s29 + $0x1b8] sm:$0xff] }
  0x1e   : > { %1341 = vmatprep.mubr.msk.f32.mxu0 %vm269_vm1, %v207_v16  ;;  %1389 = vmatprep.mubr.msk.f32.mxu1 %vm269_vm1, %v239_v17  ;;  %v225_v52 = vld [vmem:[%s1505_s29 + $0xc0] sm:$0xff]  ;;  %v226_v54 = vld [vmem:[%s1505_s29 + $0xc8] sm:$0xff]  ;;  %v227_v56 = vld [vmem:[%s1505_s29 + $0xd0] sm:$0xff] }
  0x1f   : > { %v257_v53 = vld [vmem:[%s1505_s29 + $0x1c0] sm:$0xff]  ;;  %v258_v55 = vld [vmem:[%s1505_s29 + $0x1c8] sm:$0xff]  ;;  %v259_v57 = vld [vmem:[%s1505_s29 + $0x1d0] sm:$0xff] }
  0x20   : > { %v228_v58 = vld [vmem:[%s1505_s29 + $0xd8] sm:$0xff]  ;;  %v229_v60 = vld [vmem:[%s1505_s29 + $0xe0] sm:$0xff]  ;;  %v230_v62 = vld [vmem:[%s1505_s29 + $0xe8] sm:$0xff] }
  0x21   : > { %1342 = vmatmul.mubr.msk.f32.gmra.mxu0 %vm269_vm1, %v208_v18  ;;  %1390 = vmatmul.mubr.msk.f32.gmra.mxu1 %vm269_vm1, %v240_v19  ;;  %v260_v59 = vld [vmem:[%s1505_s29 + $0x1d8] sm:$0xff]  ;;  %v261_v61 = vld [vmem:[%s1505_s29 + $0x1e0] sm:$0xff]  ;;  %v262_v63 = vld [vmem:[%s1505_s29 + $0x1e8] sm:$0xff] }
  0x22   : > { %1344 = vmatprep.mubr.msk.f32.mxu0 %vm269_vm1, %v209_v20  ;;  %1392 = vmatprep.mubr.msk.f32.mxu1 %vm269_vm1, %v241_v21  ;;  %v231_v0 = vld [vmem:[%s1505_s29 + $0xf0] sm:$0xff]  ;;  %v232_v2 = vld [vmem:[%s1505_s29 + $0xf8] sm:$0xff]  ;;  %v1638_v4 = vld [vmem:[%s1913_s2] ss:$0 sm:$0xff] }
  0x23   : > { %v263_v1 = vld [vmem:[%s1505_s29 + $0x1f0] sm:$0xff]  ;;  %v264_v3 = vld [vmem:[%s1505_s29 + $0x1f8] sm:$0xff]  ;;  %v1643_v6 = vld [vmem:[%s1914_s3] ss:$0 sm:$0xff] }
  0x25   : > { %1345 = vmatmul.mubr.msk.f32.gmra.mxu0 %vm269_vm1, %v210_v22  ;;  %1393 = vmatmul.mubr.msk.f32.gmra.mxu1 %vm269_vm1, %v242_v23 }
  0x26   : > { %1347 = vmatprep.mubr.msk.f32.mxu0 %vm269_vm1, %v211_v24  ;;  %1395 = vmatprep.mubr.msk.f32.mxu1 %vm269_vm1, %v243_v25 }
  0x29   : > { %1348 = vmatmul.mubr.msk.f32.gmra.mxu0 %vm269_vm1, %v212_v26  ;;  %1396 = vmatmul.mubr.msk.f32.gmra.mxu1 %vm269_vm1, %v244_v27 }
  0x2a   : > { %1350 = vmatprep.mubr.msk.f32.mxu0 %vm269_vm1, %v213_v28  ;;  %1398 = vmatprep.mubr.msk.f32.mxu1 %vm269_vm1, %v245_v29 }
  0x2d   : > { %1351 = vmatmul.mubr.msk.f32.gmra.mxu0 %vm269_vm1, %v214_v30  ;;  %1399 = vmatmul.mubr.msk.f32.gmra.mxu1 %vm269_vm1, %v246_v31 }
  0x2e   : > { %1353 = vmatprep.mubr.msk.f32.mxu0 %vm269_vm1, %v215_v32  ;;  %1401 = vmatprep.mubr.msk.f32.mxu1 %vm269_vm1, %v247_v33 }
  0x31   : > { %1354 = vmatmul.mubr.msk.f32.gmra.mxu0 %vm269_vm1, %v216_v34  ;;  %1402 = vmatmul.mubr.msk.f32.gmra.mxu1 %vm269_vm1, %v248_v35 }
  0x32   : > { %1356 = vmatprep.mubr.msk.f32.mxu0 %vm269_vm1, %v217_v36  ;;  %1404 = vmatprep.mubr.msk.f32.mxu1 %vm269_vm1, %v249_v37 }
  0x35   : > { %1357 = vmatmul.mubr.msk.f32.gmra.mxu0 %vm269_vm1, %v218_v38  ;;  %1405 = vmatmul.mubr.msk.f32.gmra.mxu1 %vm269_vm1, %v250_v39 }
  0x36   : > { %1359 = vmatprep.mubr.msk.f32.mxu0 %vm269_vm1, %v219_v40  ;;  %1407 = vmatprep.mubr.msk.f32.mxu1 %vm269_vm1, %v251_v41 }
  0x39   : > { %1360 = vmatmul.mubr.msk.f32.gmra.mxu0 %vm269_vm1, %v220_v42  ;;  %1408 = vmatmul.mubr.msk.f32.gmra.mxu1 %vm269_vm1, %v252_v43 }
  0x3a   : > { %1362 = vmatprep.mubr.msk.f32.mxu0 %vm269_vm1, %v221_v44  ;;  %1410 = vmatprep.mubr.msk.f32.mxu1 %vm269_vm1, %v253_v45 }
  0x3d   : > { %1363 = vmatmul.mubr.msk.f32.gmra.mxu0 %vm269_vm1, %v222_v46  ;;  %1411 = vmatmul.mubr.msk.f32.gmra.mxu1 %vm269_vm1, %v254_v47 }
  0x3e   : > { %1365 = vmatprep.mubr.msk.f32.mxu0 %vm269_vm1, %v223_v48  ;;  %1413 = vmatprep.mubr.msk.f32.mxu1 %vm269_vm1, %v255_v49 }
  0x41   : > { %1366 = vmatmul.mubr.msk.f32.gmra.mxu0 %vm269_vm1, %v224_v50  ;;  %1414 = vmatmul.mubr.msk.f32.gmra.mxu1 %vm269_vm1, %v256_v51 }
  0x42   : > { %1368 = vmatprep.mubr.msk.f32.mxu0 %vm269_vm1, %v225_v52  ;;  %1416 = vmatprep.mubr.msk.f32.mxu1 %vm269_vm1, %v257_v53 }
  0x45   : > { %1369 = vmatmul.mubr.msk.f32.gmra.mxu0 %vm269_vm1, %v226_v54  ;;  %1417 = vmatmul.mubr.msk.f32.gmra.mxu1 %vm269_vm1, %v258_v55 }
  0x46   : > { %1371 = vmatprep.mubr.msk.f32.mxu0 %vm269_vm1, %v227_v56  ;;  %1419 = vmatprep.mubr.msk.f32.mxu1 %vm269_vm1, %v259_v57 }
  0x49   : > { %1372 = vmatmul.mubr.msk.f32.gmra.mxu0 %vm269_vm1, %v228_v58  ;;  %1420 = vmatmul.mubr.msk.f32.gmra.mxu1 %vm269_vm1, %v260_v59 }
  0x4a   : > { %1374 = vmatprep.mubr.msk.f32.mxu0 %vm269_vm1, %v229_v60  ;;  %1422 = vmatprep.mubr.msk.f32.mxu1 %vm269_vm1, %v261_v61 }
  0x4d   : > { %1375 = vmatmul.mubr.msk.f32.gmra.mxu0 %vm269_vm1, %v230_v62  ;;  %1423 = vmatmul.mubr.msk.f32.gmra.mxu1 %vm269_vm1, %v262_v63 }
  0x4e   : > { %1377 = vmatprep.mubr.msk.f32.mxu0 %vm269_vm1, %v231_v0  ;;  %1425 = vmatprep.mubr.msk.f32.mxu1 %vm269_vm1, %v263_v1 }
  0x51   : > { %1378 = vmatmul.mubr.msk.f32.gmra.mxu0 %vm269_vm1, %v232_v2  ;;  %1426 = vmatmul.mubr.msk.f32.gmra.mxu1 %vm269_vm1, %v264_v3 }
  0xd5   : > { %v1334_v5 = vpop.f32.mrf.mxu0  ;;  %v1382_v7 = vpop.f32.mrf.mxu1 }
  0xd6   : > { %v859_v8 = vmul.f32 %v1334_v5, %v1638_v4  ;;  %v891_v9 = vmul.f32 %v1382_v7, %v1638_v4 }
  0xd7   : > { %v532_v10 = vpop.f32.mrf.mxu0  ;;  %v692_v11 = vpop.f32.mrf.mxu1 }
  0xd8   : > { %v930_v12 = vadd.f32 %v1643_v6, %v859_v8  ;;  %v962_v13 = vadd.f32 %v1643_v6, %v891_v9  ;;  %v858_v14 = vmul.f32 %v1638_v4, %v532_v10  ;;  %v890_v15 = vmul.f32 %v1638_v4, %v692_v11 }
  0xd9   : > { %v1337_v16 = vpop.f32.mrf.mxu0  ;;  %v1385_v17 = vpop.f32.mrf.mxu1 }
  0xda   : > { %v994_v18 = vmax.f32 %v930_v12, 0.0  ;;  %v1026_v19 = vmax.f32 %v962_v13, 0.0  ;;  %v929_v20 = vadd.f32 %v1643_v6, %v858_v14  ;;  %v961_v21 = vadd.f32 %v1643_v6, %v890_v15 }
  0xdb   : > { %v861_v22 = vmul.f32 %v1337_v16, %v1638_v4  ;;  %v893_v23 = vmul.f32 %v1385_v17, %v1638_v4  ;;  %v542_v24 = vpop.f32.mrf.mxu0  ;;  %v702_v25 = vpop.f32.mrf.mxu1 }
  0xdc   : > { %1059 = vst.msk [vmem:[%s1656_s10 + $0x8] sm:$0xff] %vm1057_vm2, %v994_v18  ;;  %1091 = vst.msk [vmem:[%s1656_s10 + $0x108] sm:$0xff] %vm1057_vm2, %v1026_v19  ;;  %v993_v26 = vmax.f32 %v929_v20, 0.0  ;;  %v1025_v27 = vmax.f32 %v961_v21, 0.0  ;;  %v860_v28 = vmul.f32 %v1638_v4, %v542_v24  ;;  %v892_v29 = vmul.f32 %v1638_v4, %v702_v25 }
  0xdd   : > { %v932_v30 = vadd.f32 %v1643_v6, %v861_v22  ;;  %v964_v31 = vadd.f32 %v1643_v6, %v893_v23  ;;  %v1340_v32 = vpop.f32.mrf.mxu0  ;;  %v1388_v33 = vpop.f32.mrf.mxu1 }
  0xde   : > { %1058 = vst.msk [vmem:[%s1656_s10] sm:$0xff] %vm1057_vm2, %v993_v26  ;;  %1090 = vst.msk [vmem:[%s1656_s10 + $0x100] sm:$0xff] %vm1057_vm2, %v1025_v27  ;;  %v931_v34 = vadd.f32 %v1643_v6, %v860_v28  ;;  %v963_v35 = vadd.f32 %v1643_v6, %v892_v29  ;;  %v863_v36 = vmul.f32 %v1340_v32, %v1638_v4 }
  0xdf   : > { %v895_v37 = vmul.f32 %v1388_v33, %v1638_v4  ;;  %v996_v38 = vmax.f32 %v932_v30, 0.0  ;;  %v1028_v39 = vmax.f32 %v964_v31, 0.0  ;;  %v552_v40 = vpop.f32.mrf.mxu0  ;;  %v712_v41 = vpop.f32.mrf.mxu1 }
  0xe0   : > { %v995_v42 = vmax.f32 %v931_v34, 0.0  ;;  %v1027_v43 = vmax.f32 %v963_v35, 0.0  ;;  %v934_v44 = vadd.f32 %v1643_v6, %v863_v36  ;;  %v862_v46 = vmul.f32 %v1638_v4, %v552_v40 }
  0xe1   : > { %v966_v45 = vadd.f32 %v1643_v6, %v895_v37  ;;  %1061 = vst.msk [vmem:[%s1656_s10 + $0x18] sm:$0xff] %vm1057_vm2, %v996_v38  ;;  %1093 = vst.msk [vmem:[%s1656_s10 + $0x118] sm:$0xff] %vm1057_vm2, %v1028_v39  ;;  %v894_v47 = vmul.f32 %v1638_v4, %v712_v41  ;;  %v1343_v48 = vpop.f32.mrf.mxu0  ;;  %v1391_v49 = vpop.f32.mrf.mxu1 }
  0xe2   : > { %1060 = vst.msk [vmem:[%s1656_s10 + $0x10] sm:$0xff] %vm1057_vm2, %v995_v42  ;;  %1092 = vst.msk [vmem:[%s1656_s10 + $0x110] sm:$0xff] %vm1057_vm2, %v1027_v43  ;;  %v998_v50 = vmax.f32 %v934_v44, 0.0  ;;  %v865_v52 = vmul.f32 %v1343_v48, %v1638_v4  ;;  %v897_v53 = vmul.f32 %v1391_v49, %v1638_v4  ;;  %v933_v54 = vadd.f32 %v1643_v6, %v862_v46 }
  0xe3   : > { %v1030_v51 = vmax.f32 %v966_v45, 0.0  ;;  %v965_v55 = vadd.f32 %v1643_v6, %v894_v47  ;;  %v562_v56 = vpop.f32.mrf.mxu0  ;;  %v722_v57 = vpop.f32.mrf.mxu1 }
  0xe4   : > { %1063 = vst.msk [vmem:[%s1656_s10 + $0x28] sm:$0xff] %vm1057_vm2, %v998_v50  ;;  %v936_v58 = vadd.f32 %v1643_v6, %v865_v52  ;;  %v968_v59 = vadd.f32 %v1643_v6, %v897_v53  ;;  %v864_v60 = vmul.f32 %v1638_v4, %v562_v56  ;;  %v896_v61 = vmul.f32 %v1638_v4, %v722_v57 }
  0xe5   : > { %1095 = vst.msk [vmem:[%s1656_s10 + $0x128] sm:$0xff] %vm1057_vm2, %v1030_v51  ;;  %v997_v62 = vmax.f32 %v933_v54, 0.0  ;;  %v1029_v63 = vmax.f32 %v965_v55, 0.0  ;;  %v1346_v0 = vpop.f32.mrf.mxu0  ;;  %v1394_v1 = vpop.f32.mrf.mxu1 }
  0xe6   : > { %v1000_v2 = vmax.f32 %v936_v58, 0.0  ;;  %v1032_v3 = vmax.f32 %v968_v59, 0.0  ;;  %v935_v5 = vadd.f32 %v1643_v6, %v864_v60  ;;  %v967_v7 = vadd.f32 %v1643_v6, %v896_v61 }
  0xe7   : > { %1062 = vst.msk [vmem:[%s1656_s10 + $0x20] sm:$0xff] %vm1057_vm2, %v997_v62  ;;  %1094 = vst.msk [vmem:[%s1656_s10 + $0x120] sm:$0xff] %vm1057_vm2, %v1029_v63  ;;  %v867_v8 = vmul.f32 %v1346_v0, %v1638_v4  ;;  %v899_v9 = vmul.f32 %v1394_v1, %v1638_v4  ;;  %v572_v10 = vpop.f32.mrf.mxu0  ;;  %v732_v11 = vpop.f32.mrf.mxu1 }
  0xe8   : > { %1065 = vst.msk [vmem:[%s1656_s10 + $0x38] sm:$0xff] %vm1057_vm2, %v1000_v2  ;;  %1097 = vst.msk [vmem:[%s1656_s10 + $0x138] sm:$0xff] %vm1057_vm2, %v1032_v3  ;;  %v999_v12 = vmax.f32 %v935_v5, 0.0  ;;  %v1031_v13 = vmax.f32 %v967_v7, 0.0  ;;  %v866_v14 = vmul.f32 %v1638_v4, %v572_v10  ;;  %v898_v15 = vmul.f32 %v1638_v4, %v732_v11 }
  0xe9   : > { %v938_v16 = vadd.f32 %v1643_v6, %v867_v8  ;;  %v970_v17 = vadd.f32 %v1643_v6, %v899_v9  ;;  %v1349_v18 = vpop.f32.mrf.mxu0  ;;  %v1397_v19 = vpop.f32.mrf.mxu1 }
  0xea   : > { %1064 = vst.msk [vmem:[%s1656_s10 + $0x30] sm:$0xff] %vm1057_vm2, %v999_v12  ;;  %1096 = vst.msk [vmem:[%s1656_s10 + $0x130] sm:$0xff] %vm1057_vm2, %v1031_v13  ;;  %v937_v20 = vadd.f32 %v1643_v6, %v866_v14  ;;  %v969_v21 = vadd.f32 %v1643_v6, %v898_v15  ;;  %v869_v22 = vmul.f32 %v1349_v18, %v1638_v4 }
  0xeb   : > { %v901_v23 = vmul.f32 %v1397_v19, %v1638_v4  ;;  %v1002_v24 = vmax.f32 %v938_v16, 0.0  ;;  %v1034_v25 = vmax.f32 %v970_v17, 0.0  ;;  %v582_v26 = vpop.f32.mrf.mxu0  ;;  %v742_v27 = vpop.f32.mrf.mxu1 }
  0xec   : > { %v1001_v28 = vmax.f32 %v937_v20, 0.0  ;;  %v1033_v29 = vmax.f32 %v969_v21, 0.0  ;;  %v940_v30 = vadd.f32 %v1643_v6, %v869_v22  ;;  %v868_v32 = vmul.f32 %v1638_v4, %v582_v26 }
  0xed   : > { %v972_v31 = vadd.f32 %v1643_v6, %v901_v23  ;;  %1067 = vst.msk [vmem:[%s1656_s10 + $0x48] sm:$0xff] %vm1057_vm2, %v1002_v24  ;;  %1099 = vst.msk [vmem:[%s1656_s10 + $0x148] sm:$0xff] %vm1057_vm2, %v1034_v25  ;;  %v900_v33 = vmul.f32 %v1638_v4, %v742_v27  ;;  %v1352_v34 = vpop.f32.mrf.mxu0  ;;  %v1400_v35 = vpop.f32.mrf.mxu1 }
  0xee   : > { %1066 = vst.msk [vmem:[%s1656_s10 + $0x40] sm:$0xff] %vm1057_vm2, %v1001_v28  ;;  %1098 = vst.msk [vmem:[%s1656_s10 + $0x140] sm:$0xff] %vm1057_vm2, %v1033_v29  ;;  %v1004_v36 = vmax.f32 %v940_v30, 0.0  ;;  %v871_v38 = vmul.f32 %v1352_v34, %v1638_v4  ;;  %v903_v39 = vmul.f32 %v1400_v35, %v1638_v4  ;;  %v939_v40 = vadd.f32 %v1643_v6, %v868_v32 }
  0xef   : > { %v1036_v37 = vmax.f32 %v972_v31, 0.0  ;;  %v971_v41 = vadd.f32 %v1643_v6, %v900_v33  ;;  %v592_v42 = vpop.f32.mrf.mxu0  ;;  %v752_v43 = vpop.f32.mrf.mxu1 }
  0xf0   : > { %1069 = vst.msk [vmem:[%s1656_s10 + $0x58] sm:$0xff] %vm1057_vm2, %v1004_v36  ;;  %v942_v44 = vadd.f32 %v1643_v6, %v871_v38  ;;  %v974_v45 = vadd.f32 %v1643_v6, %v903_v39  ;;  %v870_v46 = vmul.f32 %v1638_v4, %v592_v42  ;;  %v902_v47 = vmul.f32 %v1638_v4, %v752_v43 }
  0xf1   : > { %1101 = vst.msk [vmem:[%s1656_s10 + $0x158] sm:$0xff] %vm1057_vm2, %v1036_v37  ;;  %v1003_v48 = vmax.f32 %v939_v40, 0.0  ;;  %v1035_v49 = vmax.f32 %v971_v41, 0.0  ;;  %v1355_v50 = vpop.f32.mrf.mxu0  ;;  %v1403_v51 = vpop.f32.mrf.mxu1 }
  0xf2   : > { %v1006_v52 = vmax.f32 %v942_v44, 0.0  ;;  %v1038_v53 = vmax.f32 %v974_v45, 0.0  ;;  %v941_v54 = vadd.f32 %v1643_v6, %v870_v46  ;;  %v973_v55 = vadd.f32 %v1643_v6, %v902_v47 }
  0xf3   : > { %1068 = vst.msk [vmem:[%s1656_s10 + $0x50] sm:$0xff] %vm1057_vm2, %v1003_v48  ;;  %1100 = vst.msk [vmem:[%s1656_s10 + $0x150] sm:$0xff] %vm1057_vm2, %v1035_v49  ;;  %v873_v56 = vmul.f32 %v1355_v50, %v1638_v4  ;;  %v905_v57 = vmul.f32 %v1403_v51, %v1638_v4  ;;  %v602_v58 = vpop.f32.mrf.mxu0  ;;  %v762_v59 = vpop.f32.mrf.mxu1 }
  0xf4   : > { %1071 = vst.msk [vmem:[%s1656_s10 + $0x68] sm:$0xff] %vm1057_vm2, %v1006_v52  ;;  %1103 = vst.msk [vmem:[%s1656_s10 + $0x168] sm:$0xff] %vm1057_vm2, %v1038_v53  ;;  %v1005_v60 = vmax.f32 %v941_v54, 0.0  ;;  %v1037_v61 = vmax.f32 %v973_v55, 0.0  ;;  %v872_v62 = vmul.f32 %v1638_v4, %v602_v58  ;;  %v904_v63 = vmul.f32 %v1638_v4, %v762_v59 }
  0xf5   : > { %v944_v0 = vadd.f32 %v1643_v6, %v873_v56  ;;  %v976_v1 = vadd.f32 %v1643_v6, %v905_v57  ;;  %v1358_v2 = vpop.f32.mrf.mxu0  ;;  %v1406_v3 = vpop.f32.mrf.mxu1 }
  0xf6   : > { %1070 = vst.msk [vmem:[%s1656_s10 + $0x60] sm:$0xff] %vm1057_vm2, %v1005_v60  ;;  %1102 = vst.msk [vmem:[%s1656_s10 + $0x160] sm:$0xff] %vm1057_vm2, %v1037_v61  ;;  %v943_v5 = vadd.f32 %v1643_v6, %v872_v62  ;;  %v975_v7 = vadd.f32 %v1643_v6, %v904_v63  ;;  %v875_v8 = vmul.f32 %v1358_v2, %v1638_v4 }
  0xf7   : > { %v907_v9 = vmul.f32 %v1406_v3, %v1638_v4  ;;  %v1008_v10 = vmax.f32 %v944_v0, 0.0  ;;  %v1040_v11 = vmax.f32 %v976_v1, 0.0  ;;  %v612_v12 = vpop.f32.mrf.mxu0  ;;  %v772_v13 = vpop.f32.mrf.mxu1 }
  0xf8   : > { %v1007_v14 = vmax.f32 %v943_v5, 0.0  ;;  %v1039_v15 = vmax.f32 %v975_v7, 0.0  ;;  %v946_v16 = vadd.f32 %v1643_v6, %v875_v8  ;;  %v874_v18 = vmul.f32 %v1638_v4, %v612_v12 }
  0xf9   : > { %v978_v17 = vadd.f32 %v1643_v6, %v907_v9  ;;  %1073 = vst.msk [vmem:[%s1656_s10 + $0x78] sm:$0xff] %vm1057_vm2, %v1008_v10  ;;  %1105 = vst.msk [vmem:[%s1656_s10 + $0x178] sm:$0xff] %vm1057_vm2, %v1040_v11  ;;  %v906_v19 = vmul.f32 %v1638_v4, %v772_v13  ;;  %v1361_v20 = vpop.f32.mrf.mxu0  ;;  %v1409_v21 = vpop.f32.mrf.mxu1 }
  0xfa   : > { %1072 = vst.msk [vmem:[%s1656_s10 + $0x70] sm:$0xff] %vm1057_vm2, %v1007_v14  ;;  %1104 = vst.msk [vmem:[%s1656_s10 + $0x170] sm:$0xff] %vm1057_vm2, %v1039_v15  ;;  %v1010_v22 = vmax.f32 %v946_v16, 0.0  ;;  %v877_v24 = vmul.f32 %v1361_v20, %v1638_v4  ;;  %v909_v25 = vmul.f32 %v1409_v21, %v1638_v4  ;;  %v945_v26 = vadd.f32 %v1643_v6, %v874_v18 }
  0xfb   : > { %v1042_v23 = vmax.f32 %v978_v17, 0.0  ;;  %v977_v27 = vadd.f32 %v1643_v6, %v906_v19  ;;  %v622_v28 = vpop.f32.mrf.mxu0  ;;  %v782_v29 = vpop.f32.mrf.mxu1 }
  0xfc   : > { %1075 = vst.msk [vmem:[%s1656_s10 + $0x88] sm:$0xff] %vm1057_vm2, %v1010_v22  ;;  %v948_v30 = vadd.f32 %v1643_v6, %v877_v24  ;;  %v980_v31 = vadd.f32 %v1643_v6, %v909_v25  ;;  %v876_v32 = vmul.f32 %v1638_v4, %v622_v28  ;;  %v908_v33 = vmul.f32 %v1638_v4, %v782_v29 }
  0xfd   : > { %1107 = vst.msk [vmem:[%s1656_s10 + $0x188] sm:$0xff] %vm1057_vm2, %v1042_v23  ;;  %v1009_v34 = vmax.f32 %v945_v26, 0.0  ;;  %v1041_v35 = vmax.f32 %v977_v27, 0.0  ;;  %v1364_v36 = vpop.f32.mrf.mxu0  ;;  %v1412_v37 = vpop.f32.mrf.mxu1 }
  0xfe   : > { %v1012_v38 = vmax.f32 %v948_v30, 0.0  ;;  %v1044_v39 = vmax.f32 %v980_v31, 0.0  ;;  %v947_v40 = vadd.f32 %v1643_v6, %v876_v32  ;;  %v979_v41 = vadd.f32 %v1643_v6, %v908_v33 }
  0xff   : > { %1074 = vst.msk [vmem:[%s1656_s10 + $0x80] sm:$0xff] %vm1057_vm2, %v1009_v34  ;;  %1106 = vst.msk [vmem:[%s1656_s10 + $0x180] sm:$0xff] %vm1057_vm2, %v1041_v35  ;;  %v879_v42 = vmul.f32 %v1364_v36, %v1638_v4  ;;  %v911_v43 = vmul.f32 %v1412_v37, %v1638_v4  ;;  %v632_v44 = vpop.f32.mrf.mxu0  ;;  %v792_v45 = vpop.f32.mrf.mxu1 }
 0x100   : > { %1077 = vst.msk [vmem:[%s1656_s10 + $0x98] sm:$0xff] %vm1057_vm2, %v1012_v38  ;;  %1109 = vst.msk [vmem:[%s1656_s10 + $0x198] sm:$0xff] %vm1057_vm2, %v1044_v39  ;;  %v1011_v46 = vmax.f32 %v947_v40, 0.0  ;;  %v1043_v47 = vmax.f32 %v979_v41, 0.0  ;;  %v878_v48 = vmul.f32 %v1638_v4, %v632_v44  ;;  %v910_v49 = vmul.f32 %v1638_v4, %v792_v45 }
 0x101   : > { %v950_v50 = vadd.f32 %v1643_v6, %v879_v42  ;;  %v982_v51 = vadd.f32 %v1643_v6, %v911_v43  ;;  %v1367_v52 = vpop.f32.mrf.mxu0  ;;  %v1415_v53 = vpop.f32.mrf.mxu1 }
 0x102   : > { %1076 = vst.msk [vmem:[%s1656_s10 + $0x90] sm:$0xff] %vm1057_vm2, %v1011_v46  ;;  %1108 = vst.msk [vmem:[%s1656_s10 + $0x190] sm:$0xff] %vm1057_vm2, %v1043_v47  ;;  %v949_v54 = vadd.f32 %v1643_v6, %v878_v48  ;;  %v981_v55 = vadd.f32 %v1643_v6, %v910_v49  ;;  %v881_v56 = vmul.f32 %v1367_v52, %v1638_v4 }
 0x103   : > { %v913_v57 = vmul.f32 %v1415_v53, %v1638_v4  ;;  %v1014_v58 = vmax.f32 %v950_v50, 0.0  ;;  %v1046_v59 = vmax.f32 %v982_v51, 0.0  ;;  %v642_v60 = vpop.f32.mrf.mxu0  ;;  %v802_v61 = vpop.f32.mrf.mxu1 }
 0x104   : > { %v1013_v62 = vmax.f32 %v949_v54, 0.0  ;;  %v1045_v63 = vmax.f32 %v981_v55, 0.0  ;;  %v952_v0 = vadd.f32 %v1643_v6, %v881_v56  ;;  %v880_v2 = vmul.f32 %v1638_v4, %v642_v60 }
 0x105   : > { %v984_v1 = vadd.f32 %v1643_v6, %v913_v57  ;;  %1079 = vst.msk [vmem:[%s1656_s10 + $0xa8] sm:$0xff] %vm1057_vm2, %v1014_v58  ;;  %1111 = vst.msk [vmem:[%s1656_s10 + $0x1a8] sm:$0xff] %vm1057_vm2, %v1046_v59  ;;  %v912_v3 = vmul.f32 %v1638_v4, %v802_v61  ;;  %v1370_v5 = vpop.f32.mrf.mxu0  ;;  %v1418_v7 = vpop.f32.mrf.mxu1 }
 0x106   : > { %1078 = vst.msk [vmem:[%s1656_s10 + $0xa0] sm:$0xff] %vm1057_vm2, %v1013_v62  ;;  %1110 = vst.msk [vmem:[%s1656_s10 + $0x1a0] sm:$0xff] %vm1057_vm2, %v1045_v63  ;;  %v1016_v8 = vmax.f32 %v952_v0, 0.0  ;;  %v883_v10 = vmul.f32 %v1370_v5, %v1638_v4  ;;  %v915_v11 = vmul.f32 %v1418_v7, %v1638_v4  ;;  %v951_v12 = vadd.f32 %v1643_v6, %v880_v2 }
 0x107   : > { %v1048_v9 = vmax.f32 %v984_v1, 0.0  ;;  %v983_v13 = vadd.f32 %v1643_v6, %v912_v3  ;;  %v652_v14 = vpop.f32.mrf.mxu0  ;;  %v812_v15 = vpop.f32.mrf.mxu1 }
 0x108   : > { %1081 = vst.msk [vmem:[%s1656_s10 + $0xb8] sm:$0xff] %vm1057_vm2, %v1016_v8  ;;  %v954_v16 = vadd.f32 %v1643_v6, %v883_v10  ;;  %v986_v17 = vadd.f32 %v1643_v6, %v915_v11  ;;  %v882_v18 = vmul.f32 %v1638_v4, %v652_v14  ;;  %v914_v19 = vmul.f32 %v1638_v4, %v812_v15 }
 0x109   : > { %1113 = vst.msk [vmem:[%s1656_s10 + $0x1b8] sm:$0xff] %vm1057_vm2, %v1048_v9  ;;  %v1015_v20 = vmax.f32 %v951_v12, 0.0  ;;  %v1047_v21 = vmax.f32 %v983_v13, 0.0  ;;  %v1373_v22 = vpop.f32.mrf.mxu0  ;;  %v1421_v23 = vpop.f32.mrf.mxu1 }
 0x10a   : > { %v1018_v24 = vmax.f32 %v954_v16, 0.0  ;;  %v1050_v25 = vmax.f32 %v986_v17, 0.0  ;;  %v953_v26 = vadd.f32 %v1643_v6, %v882_v18  ;;  %v985_v27 = vadd.f32 %v1643_v6, %v914_v19 }
 0x10b   : > { %1080 = vst.msk [vmem:[%s1656_s10 + $0xb0] sm:$0xff] %vm1057_vm2, %v1015_v20  ;;  %1112 = vst.msk [vmem:[%s1656_s10 + $0x1b0] sm:$0xff] %vm1057_vm2, %v1047_v21  ;;  %v885_v28 = vmul.f32 %v1373_v22, %v1638_v4  ;;  %v917_v29 = vmul.f32 %v1421_v23, %v1638_v4  ;;  %v662_v30 = vpop.f32.mrf.mxu0  ;;  %v822_v31 = vpop.f32.mrf.mxu1 }
 0x10c   : > { %1083 = vst.msk [vmem:[%s1656_s10 + $0xc8] sm:$0xff] %vm1057_vm2, %v1018_v24  ;;  %1115 = vst.msk [vmem:[%s1656_s10 + $0x1c8] sm:$0xff] %vm1057_vm2, %v1050_v25  ;;  %v1017_v32 = vmax.f32 %v953_v26, 0.0  ;;  %v1049_v33 = vmax.f32 %v985_v27, 0.0  ;;  %v884_v34 = vmul.f32 %v1638_v4, %v662_v30  ;;  %v916_v35 = vmul.f32 %v1638_v4, %v822_v31 }
 0x10d   : > { %v956_v36 = vadd.f32 %v1643_v6, %v885_v28  ;;  %v988_v37 = vadd.f32 %v1643_v6, %v917_v29  ;;  %v1376_v38 = vpop.f32.mrf.mxu0  ;;  %v1424_v39 = vpop.f32.mrf.mxu1 }
 0x10e   : > { %1082 = vst.msk [vmem:[%s1656_s10 + $0xc0] sm:$0xff] %vm1057_vm2, %v1017_v32  ;;  %1114 = vst.msk [vmem:[%s1656_s10 + $0x1c0] sm:$0xff] %vm1057_vm2, %v1049_v33  ;;  %v955_v40 = vadd.f32 %v1643_v6, %v884_v34  ;;  %v987_v41 = vadd.f32 %v1643_v6, %v916_v35  ;;  %v887_v42 = vmul.f32 %v1376_v38, %v1638_v4 }
 0x10f   : > { %v919_v43 = vmul.f32 %v1424_v39, %v1638_v4  ;;  %v1020_v44 = vmax.f32 %v956_v36, 0.0  ;;  %v1052_v45 = vmax.f32 %v988_v37, 0.0  ;;  %v672_v46 = vpop.f32.mrf.mxu0  ;;  %v832_v47 = vpop.f32.mrf.mxu1 }
 0x110   : > { %v1019_v48 = vmax.f32 %v955_v40, 0.0  ;;  %v1051_v49 = vmax.f32 %v987_v41, 0.0  ;;  %v958_v50 = vadd.f32 %v1643_v6, %v887_v42  ;;  %v886_v52 = vmul.f32 %v1638_v4, %v672_v46 }
 0x111   : > { %v990_v51 = vadd.f32 %v1643_v6, %v919_v43  ;;  %1085 = vst.msk [vmem:[%s1656_s10 + $0xd8] sm:$0xff] %vm1057_vm2, %v1020_v44  ;;  %1117 = vst.msk [vmem:[%s1656_s10 + $0x1d8] sm:$0xff] %vm1057_vm2, %v1052_v45  ;;  %v918_v53 = vmul.f32 %v1638_v4, %v832_v47  ;;  %v1379_v54 = vpop.f32.mrf.mxu0  ;;  %v1427_v55 = vpop.f32.mrf.mxu1 }
 0x112   : > { %1084 = vst.msk [vmem:[%s1656_s10 + $0xd0] sm:$0xff] %vm1057_vm2, %v1019_v48  ;;  %1116 = vst.msk [vmem:[%s1656_s10 + $0x1d0] sm:$0xff] %vm1057_vm2, %v1051_v49  ;;  %v1022_v56 = vmax.f32 %v958_v50, 0.0  ;;  %v889_v58 = vmul.f32 %v1379_v54, %v1638_v4  ;;  %v921_v59 = vmul.f32 %v1427_v55, %v1638_v4  ;;  %v957_v60 = vadd.f32 %v1643_v6, %v886_v52 }
 0x113   : > { %v1054_v57 = vmax.f32 %v990_v51, 0.0  ;;  %v989_v61 = vadd.f32 %v1643_v6, %v918_v53  ;;  %v682_v62 = vpop.f32.mrf.mxu0  ;;  %v842_v63 = vpop.f32.mrf.mxu1 }
 0x114   : > { %1087 = vst.msk [vmem:[%s1656_s10 + $0xe8] sm:$0xff] %vm1057_vm2, %v1022_v56  ;;  %v960_v0 = vadd.f32 %v1643_v6, %v889_v58  ;;  %v992_v1 = vadd.f32 %v1643_v6, %v921_v59  ;;  %v888_v2 = vmul.f32 %v1638_v4, %v682_v62  ;;  %v920_v3 = vmul.f32 %v1638_v4, %v842_v63 }
 0x115   : > { %1119 = vst.msk [vmem:[%s1656_s10 + $0x1e8] sm:$0xff] %vm1057_vm2, %v1054_v57  ;;  %v1021_v5 = vmax.f32 %v957_v60, 0.0  ;;  %v1053_v7 = vmax.f32 %v989_v61, 0.0 }
 0x116   : > { %v1024_v8 = vmax.f32 %v960_v0, 0.0  ;;  %v1056_v9 = vmax.f32 %v992_v1, 0.0  ;;  %v959_v10 = vadd.f32 %v1643_v6, %v888_v2  ;;  %v991_v11 = vadd.f32 %v1643_v6, %v920_v3 }
 0x117   : > { %1086 = vst.msk [vmem:[%s1656_s10 + $0xe0] sm:$0xff] %vm1057_vm2, %v1021_v5  ;;  %1118 = vst.msk [vmem:[%s1656_s10 + $0x1e0] sm:$0xff] %vm1057_vm2, %v1053_v7 }
 0x118   : > { %1089 = vst.msk [vmem:[%s1656_s10 + $0xf8] sm:$0xff] %vm1057_vm2, %v1024_v8  ;;  %1121 = vst.msk [vmem:[%s1656_s10 + $0x1f8] sm:$0xff] %vm1057_vm2, %v1056_v9  ;;  %v1023_v12 = vmax.f32 %v959_v10, 0.0  ;;  %v1055_v13 = vmax.f32 %v991_v11, 0.0 }
 0x11a   : > { %1088 = vst.msk [vmem:[%s1656_s10 + $0xf0] sm:$0xff] %vm1057_vm2, %v1023_v12  ;;  %1120 = vst.msk [vmem:[%s1656_s10 + $0x1f0] sm:$0xff] %vm1057_vm2, %v1055_v13 }
 0x11b PF: > { %s14_s15 = sadd.s32 1, %s1450_s15  }
 0x11c   : > { %p11_p4 = scmp.ge.s32.totalorder %s14_s15, 4  }
 0x11e   :  { %13 = sbr.rel (!%p11_p4) target bundleno = 1 (0x1), region = 66 }

</bundles_post_ra>
